<compile_context>
chip_gen: v5e
topology: v5e:2x2
jax: 0.10.0
libtpu: 0.0.40
codegen_flags: <defaults>
</compile_context>

<pallas_src>
import jax
import jax.numpy as jnp
from jax.experimental import pallas as pl
from jax.experimental.pallas import tpu as pltpu


def _round_up(n, m):
    return ((n + m - 1) // m) * m


def _make_kernel(T, Bp, I, H, FH, Np, offs):
    """Kernel with static T (timesteps), Bp (padded batch), I, H, FH=4H, Np (padded horizon)."""
    o_wih, o_whh, o_b, o_wfc, o_bfc = offs

    def kernel(x_ref, p_ref, y_ref):
        # x_ref: (T*Bp, I)   time-major, batch padded to a multiple of 8
        # p_ref: (P, W)      packed params (one DMA), 8-row-aligned segments:
        #   rows [o_wih, o_wih+I) lanes [:FH]  = W_ih^T  (i/f/o cols pre-scaled by 0.5)
        #   rows [o_whh, o_whh+H) lanes [:FH]  = W_hh^T  (i/f/o cols pre-scaled by 0.5)
        #   rows [o_b  , o_b+1 )  lanes [:FH]  = (b_ih + b_hh), i/f/o entries scaled by 0.5
        #   rows [o_wfc, o_wfc+H) lanes [:Np]  = W_fc^T zero-padded to Np lanes
        #   rows [o_bfc, o_bfc+1) lanes [:Np]  = b_fc   zero-padded to Np lanes
        # y_ref: (Bp, Np)    lane-dense output (unmasked full-lane store)

        wih = p_ref[o_wih:o_wih + I, :FH]          # (I, 4H)
        whh = p_ref[o_whh:o_whh + H, :FH]          # (H, 4H)  resident across all steps
        b   = p_ref[o_b:o_b + 1, :FH]              # (1, 4H)

        # Hoisted input projection for ALL timesteps: one M=T*Bp matmul.
        gx = (jnp.dot(x_ref[...], wih, preferred_element_type=jnp.float32)
              + b)                                  # (T*Bp, 4H)

        h = jnp.zeros((Bp, H), jnp.float32)
        c = jnp.zeros((Bp, H), jnp.float32)

        # Statically unrolled recurrence (T small, known at trace time).
        for t in range(T):
            g = gx[t * Bp:(t + 1) * Bp, :] + jnp.dot(
                h, whh, preferred_element_type=jnp.float32)     # (Bp, 4H)

            # ONE full-width tanh (EUP); sigmoid(z) == 0.5*tanh(z/2)+0.5 and the
            # i/f/o pre-activations were already halved via the packed weights.
            tg = jnp.tanh(g)                       # EUP push #1
            s = 0.5 * tg + 0.5                     # full-width VPU fma
            i_g = s[:, 0 * H:1 * H]
            f_g = s[:, 1 * H:2 * H]
            g_g = tg[:, 2 * H:3 * H]               # cell input: tanh directly
            o_g = s[:, 3 * H:4 * H]

            c = f_g * c + i_g * g_g
            h = o_g * jnp.tanh(c)                  # EUP push #2

        # Fully-connected head on the last hidden state (lane-dense, padded to Np).
        wfc = p_ref[o_wfc:o_wfc + H, :Np]          # (H, Np)
        bfc = p_ref[o_bfc:o_bfc + 1, :Np]          # (1, Np)
        y = jnp.dot(h, wfc, preferred_element_type=jnp.float32) + bfc
        y_ref[...] = y.astype(y_ref.dtype)

    return kernel


def prepare_params(params, hidden_size, horizon):
    """ONE-TIME parameter prep (not on the per-call hot path): transpose/cast,
    pre-scale i/f/o gate columns by 0.5 (tanh trick), pad the FC head to 128
    lanes, and pack everything into a single lane-dense (P, 128) f32 buffer."""
    H = hidden_size
    FH = 4 * H
    w_ih = jnp.asarray(params["w_ih"], jnp.float32)            # (4H, I)
    w_hh = jnp.asarray(params["w_hh"], jnp.float32)            # (4H, H)
    b_all = jnp.asarray(params["b_ih"] + params["b_hh"], jnp.float32)  # (4H,)
    w_fc = jnp.asarray(params["w_fc"], jnp.float32)            # (horizon, H)
    b_fc = jnp.asarray(params["b_fc"], jnp.float32)            # (horizon,)
    I = w_ih.shape[1]

    # PyTorch gate order along 4H is [i, f, g, o]; scale i/f/o rows by 0.5,
    # leave g unscaled (it keeps its direct tanh).
    scale = jnp.concatenate([jnp.full((H,), 0.5, jnp.float32),
                             jnp.full((H,), 0.5, jnp.float32),
                             jnp.ones((H,), jnp.float32),
                             jnp.full((H,), 0.5, jnp.float32)])
    wih_t = (w_ih * scale[:, None]).T                           # (I, 4H)
    whh_t = (w_hh * scale[:, None]).T                           # (H, 4H)
    b_s = (b_all * scale)[None, :]                              # (1, 4H)
    wfc_t = w_fc.T                                              # (H, horizon)
    bfc = b_fc[None, :]                                         # (1, horizon)

    Np = _round_up(horizon, 128)                                # lane-dense FC width
    W = max(_round_up(FH, 128), Np)                             # packed lane width

    I_p = _round_up(max(I, 8), 8)
    H_p = _round_up(H, 8)

    def seg(a, rows):
        out = jnp.zeros((rows, W), jnp.float32)
        return out.at[:a.shape[0], :a.shape[1]].set(a)

    o_wih = 0
    o_whh = o_wih + I_p
    o_b = o_whh + H_p
    o_wfc = o_b + 8
    o_bfc = o_wfc + H_p

    packed = jnp.concatenate(
        [seg(wih_t, I_p), seg(whh_t, H_p), seg(b_s, 8),
         seg(wfc_t, H_p), seg(bfc, 8)], axis=0)                 # (P, W) f32

    meta = {"I": I, "H": H, "FH": FH, "horizon": horizon, "Np": Np, "W": W,
            "offs": (o_wih, o_whh, o_b, o_wfc, o_bfc)}
    return packed, meta


def multi_feature_lstm(x, packed, meta):
    """x: (B, T, I) float32 (batch_first, like the PyTorch module). Returns (B, horizon)."""
    B, T, I = x.shape
    H, FH, Np = meta["H"], meta["FH"], meta["Np"]
    Bp = max(8, _round_up(B, 8))

    # Per-call glue on x only (~B*T*I*4 bytes): time-major + batch pad + flatten.
    # Under jax.jit this is a single tiny fusion feeding the kernel.
    x_tm = jnp.swapaxes(x, 0, 1).astype(jnp.float32)            # (T, B, I)
    if Bp != B:
        x_tm = jnp.pad(x_tm, ((0, 0), (0, Bp - B), (0, 0)))     # (T, Bp, I)
    x2 = x_tm.reshape(T * Bp, I)                                # (T*Bp, I)

    vmem = lambda: pl.BlockSpec(memory_space=pltpu.MemorySpace.VMEM)
    y = pl.pallas_call(
        _make_kernel(T, Bp, I, H, FH, Np, meta["offs"]),
        out_shape=jax.ShapeDtypeStruct((Bp, Np), jnp.float32),
        in_specs=[vmem(), vmem()],        # two DMAs total: x and packed params
        out_specs=vmem(),
    )(x2, packed)

    return y[:B, :meta["horizon"]]


def _reference(x, params):
    """Pure-JAX reference matching torch.nn.LSTM(batch_first) + Linear."""
    H = params["w_hh"].shape[1]
    wih, whh = params["w_ih"], params["w_hh"]
    b = params["b_ih"] + params["b_hh"]

    def step(carry, x_t):
        h, c = carry
        gates = x_t @ wih.T + h @ whh.T + b
        i = jax.nn.sigmoid(gates[:, 0 * H:1 * H])
        f = jax.nn.sigmoid(gates[:, 1 * H:2 * H])
        g = jnp.tanh(gates[:, 2 * H:3 * H])
        o = jax.nn.sigmoid(gates[:, 3 * H:4 * H])
        c = f * c + i * g
        h = o * jnp.tanh(c)
        return (h, c), None

    B = x.shape[0]
    h0 = jnp.zeros((B, H), jnp.float32)
    c0 = jnp.zeros((B, H), jnp.float32)
    (h_last, _), _ = jax.lax.scan(step, (h0, c0), jnp.transpose(x, (1, 0, 2)))
    return h_last @ params["w_fc"].T + params["b_fc"]


def init_params(key, input_size, hidden_size, horizon):
    """Deterministic init (uniform +-1/sqrt(H), same recipe as torch defaults)."""
    ks = jax.random.split(key, 6)
    s = 1.0 / jnp.sqrt(hidden_size)
    u = lambda k, shape: jax.random.uniform(k, shape, jnp.float32, -s, s)
    return {
        "w_ih": u(ks[0], (4 * hidden_size, input_size)),
        "w_hh": u(ks[1], (4 * hidden_size, hidden_size)),
        "b_ih": u(ks[2], (4 * hidden_size,)),
        "b_hh": u(ks[3], (4 * hidden_size,)),
        "w_fc": u(ks[4], (horizon, hidden_size)),
        "b_fc": u(ks[5], (horizon,)),
    }


if __name__ == "__main__":
    B, T, INPUT, HIDDEN, HORIZON = 2, 8, 4, 32, 24

    key = jax.random.PRNGKey(0)
    kx, kp = jax.random.split(key)
    x = jax.random.normal(kx, (B, T, INPUT), jnp.float32)
    params = init_params(kp, INPUT, HIDDEN, HORIZON)

    # One-time weight prep (off the hot path), then a jitted forward so the
    # per-call graph is [tiny x-prep fusion] -> [pallas kernel] -> [slice].
    packed, meta = prepare_params(params, HIDDEN, HORIZON)
    forward = jax.jit(lambda xx, pp: multi_feature_lstm(xx, pp, meta))

    y = jax.block_until_ready(forward(x, packed))
    y_ref = jax.block_until_ready(_reference(x, params))

    assert y.shape == (B, HORIZON)
    assert jnp.allclose(y, y_ref, atol=1e-4, rtol=1e-4)
    print("KERNEL_OK")
</pallas_src>

<mosaic_0001>
module attributes {stable_mosaic.version = 11 : i64} {
  func.func @kernel(%arg0: memref<64x4xf32, #tpu.memory_space<vmem>>, %arg1: memref<88x128xf32, #tpu.memory_space<vmem>>, %arg2: memref<8x128xf32, #tpu.memory_space<vmem>>) attributes {dimension_semantics = [], scalar_prefetch = 0 : i64, scratch_operands = 0 : i64, tpu.core_type = #tpu.core_type<tc>} {
    %c0 = arith.constant 0 : index
    %c0_0 = arith.constant 0 : index
    %0 = vector.load %arg1[%c0, %c0_0] : memref<88x128xf32, #tpu.memory_space<vmem>>, vector<4x128xf32>
    %c8 = arith.constant 8 : index
    %c0_1 = arith.constant 0 : index
    %1 = vector.load %arg1[%c8, %c0_1] : memref<88x128xf32, #tpu.memory_space<vmem>>, vector<32x128xf32>
    %c40 = arith.constant 40 : index
    %c0_2 = arith.constant 0 : index
    %2 = vector.load %arg1[%c40, %c0_2] : memref<88x128xf32, #tpu.memory_space<vmem>>, vector<1x128xf32>
    %c0_3 = arith.constant 0 : index
    %c0_4 = arith.constant 0 : index
    %3 = vector.load %arg0[%c0_3, %c0_4] : memref<64x4xf32, #tpu.memory_space<vmem>>, vector<64x4xf32>
    %cst = arith.constant dense<0.000000e+00> : vector<64x128xf32>
    %4 = tpu.matmul %3, %0, %cst {dimension_numbers = #tpu.dot_dimension_numbers<[1], [0], [0], [1], [0, 0, 1, 1], [], []>} : vector<64x4xf32>, vector<4x128xf32>, vector<64x128xf32> -> vector<64x128xf32>
    %5 = vector.broadcast %2 : vector<1x128xf32> to vector<64x128xf32>
    %6 = arith.addf %4, %5 : vector<64x128xf32>
    %cst_5 = arith.constant 0.000000e+00 : f32
    %7 = vector.broadcast %cst_5 : f32 to vector<8x32xf32>
    %cst_6 = arith.constant 0.000000e+00 : f32
    %8 = vector.broadcast %cst_6 : f32 to vector<8x32xf32>
    %9 = vector.extract_strided_slice %6 {offsets = [0, 0], sizes = [8, 128], strides = [1, 1]} : vector<64x128xf32> to vector<8x128xf32>
    %cst_7 = arith.constant dense<0.000000e+00> : vector<8x128xf32>
    %10 = tpu.matmul %7, %1, %cst_7 {dimension_numbers = #tpu.dot_dimension_numbers<[1], [0], [0], [1], [0, 0, 1, 1], [], []>} : vector<8x32xf32>, vector<32x128xf32>, vector<8x128xf32> -> vector<8x128xf32>
    %11 = arith.addf %9, %10 : vector<8x128xf32>
    %12 = math.tanh %11 : vector<8x128xf32>
    %cst_8 = arith.constant 5.000000e-01 : f32
    %13 = vector.broadcast %cst_8 : f32 to vector<8x128xf32>
    %14 = arith.mulf %13, %12 : vector<8x128xf32>
    %cst_9 = arith.constant 5.000000e-01 : f32
    %15 = vector.broadcast %cst_9 : f32 to vector<8x128xf32>
    %16 = arith.addf %14, %15 : vector<8x128xf32>
    %17 = vector.extract_strided_slice %16 {offsets = [0, 0], sizes = [8, 32], strides = [1, 1]} : vector<8x128xf32> to vector<8x32xf32>
    %18 = vector.extract_strided_slice %16 {offsets = [0, 32], sizes = [8, 32], strides = [1, 1]} : vector<8x128xf32> to vector<8x32xf32>
    %19 = vector.extract_strided_slice %12 {offsets = [0, 64], sizes = [8, 32], strides = [1, 1]} : vector<8x128xf32> to vector<8x32xf32>
    %20 = vector.extract_strided_slice %16 {offsets = [0, 96], sizes = [8, 32], strides = [1, 1]} : vector<8x128xf32> to vector<8x32xf32>
    %21 = arith.mulf %18, %8 : vector<8x32xf32>
    %22 = arith.mulf %17, %19 : vector<8x32xf32>
    %23 = arith.addf %21, %22 : vector<8x32xf32>
    %24 = math.tanh %23 : vector<8x32xf32>
    %25 = arith.mulf %20, %24 : vector<8x32xf32>
    %26 = vector.extract_strided_slice %6 {offsets = [8, 0], sizes = [8, 128], strides = [1, 1]} : vector<64x128xf32> to vector<8x128xf32>
    %cst_10 = arith.constant dense<0.000000e+00> : vector<8x128xf32>
    %27 = tpu.matmul %25, %1, %cst_10 {dimension_numbers = #tpu.dot_dimension_numbers<[1], [0], [0], [1], [0, 0, 1, 1], [], []>} : vector<8x32xf32>, vector<32x128xf32>, vector<8x128xf32> -> vector<8x128xf32>
    %28 = arith.addf %26, %27 : vector<8x128xf32>
    %29 = math.tanh %28 : vector<8x128xf32>
    %cst_11 = arith.constant 5.000000e-01 : f32
    %30 = vector.broadcast %cst_11 : f32 to vector<8x128xf32>
    %31 = arith.mulf %30, %29 : vector<8x128xf32>
    %cst_12 = arith.constant 5.000000e-01 : f32
    %32 = vector.broadcast %cst_12 : f32 to vector<8x128xf32>
    %33 = arith.addf %31, %32 : vector<8x128xf32>
    %34 = vector.extract_strided_slice %33 {offsets = [0, 0], sizes = [8, 32], strides = [1, 1]} : vector<8x128xf32> to vector<8x32xf32>
    %35 = vector.extract_strided_slice %33 {offsets = [0, 32], sizes = [8, 32], strides = [1, 1]} : vector<8x128xf32> to vector<8x32xf32>
    %36 = vector.extract_strided_slice %29 {offsets = [0, 64], sizes = [8, 32], strides = [1, 1]} : vector<8x128xf32> to vector<8x32xf32>
    %37 = vector.extract_strided_slice %33 {offsets = [0, 96], sizes = [8, 32], strides = [1, 1]} : vector<8x128xf32> to vector<8x32xf32>
    %38 = arith.mulf %35, %23 : vector<8x32xf32>
    %39 = arith.mulf %34, %36 : vector<8x32xf32>
    %40 = arith.addf %38, %39 : vector<8x32xf32>
    %41 = math.tanh %40 : vector<8x32xf32>
    %42 = arith.mulf %37, %41 : vector<8x32xf32>
    %43 = vector.extract_strided_slice %6 {offsets = [16, 0], sizes = [8, 128], strides = [1, 1]} : vector<64x128xf32> to vector<8x128xf32>
    %cst_13 = arith.constant dense<0.000000e+00> : vector<8x128xf32>
    %44 = tpu.matmul %42, %1, %cst_13 {dimension_numbers = #tpu.dot_dimension_numbers<[1], [0], [0], [1], [0, 0, 1, 1], [], []>} : vector<8x32xf32>, vector<32x128xf32>, vector<8x128xf32> -> vector<8x128xf32>
    %45 = arith.addf %43, %44 : vector<8x128xf32>
    %46 = math.tanh %45 : vector<8x128xf32>
    %cst_14 = arith.constant 5.000000e-01 : f32
    %47 = vector.broadcast %cst_14 : f32 to vector<8x128xf32>
    %48 = arith.mulf %47, %46 : vector<8x128xf32>
    %cst_15 = arith.constant 5.000000e-01 : f32
    %49 = vector.broadcast %cst_15 : f32 to vector<8x128xf32>
    %50 = arith.addf %48, %49 : vector<8x128xf32>
    %51 = vector.extract_strided_slice %50 {offsets = [0, 0], sizes = [8, 32], strides = [1, 1]} : vector<8x128xf32> to vector<8x32xf32>
    %52 = vector.extract_strided_slice %50 {offsets = [0, 32], sizes = [8, 32], strides = [1, 1]} : vector<8x128xf32> to vector<8x32xf32>
    %53 = vector.extract_strided_slice %46 {offsets = [0, 64], sizes = [8, 32], strides = [1, 1]} : vector<8x128xf32> to vector<8x32xf32>
    %54 = vector.extract_strided_slice %50 {offsets = [0, 96], sizes = [8, 32], strides = [1, 1]} : vector<8x128xf32> to vector<8x32xf32>
    %55 = arith.mulf %52, %40 : vector<8x32xf32>
    %56 = arith.mulf %51, %53 : vector<8x32xf32>
    %57 = arith.addf %55, %56 : vector<8x32xf32>
    %58 = math.tanh %57 : vector<8x32xf32>
    %59 = arith.mulf %54, %58 : vector<8x32xf32>
    %60 = vector.extract_strided_slice %6 {offsets = [24, 0], sizes = [8, 128], strides = [1, 1]} : vector<64x128xf32> to vector<8x128xf32>
    %cst_16 = arith.constant dense<0.000000e+00> : vector<8x128xf32>
    %61 = tpu.matmul %59, %1, %cst_16 {dimension_numbers = #tpu.dot_dimension_numbers<[1], [0], [0], [1], [0, 0, 1, 1], [], []>} : vector<8x32xf32>, vector<32x128xf32>, vector<8x128xf32> -> vector<8x128xf32>
    %62 = arith.addf %60, %61 : vector<8x128xf32>
    %63 = math.tanh %62 : vector<8x128xf32>
    %cst_17 = arith.constant 5.000000e-01 : f32
    %64 = vector.broadcast %cst_17 : f32 to vector<8x128xf32>
    %65 = arith.mulf %64, %63 : vector<8x128xf32>
    %cst_18 = arith.constant 5.000000e-01 : f32
    %66 = vector.broadcast %cst_18 : f32 to vector<8x128xf32>
    %67 = arith.addf %65, %66 : vector<8x128xf32>
    %68 = vector.extract_strided_slice %67 {offsets = [0, 0], sizes = [8, 32], strides = [1, 1]} : vector<8x128xf32> to vector<8x32xf32>
    %69 = vector.extract_strided_slice %67 {offsets = [0, 32], sizes = [8, 32], strides = [1, 1]} : vector<8x128xf32> to vector<8x32xf32>
    %70 = vector.extract_strided_slice %63 {offsets = [0, 64], sizes = [8, 32], strides = [1, 1]} : vector<8x128xf32> to vector<8x32xf32>
    %71 = vector.extract_strided_slice %67 {offsets = [0, 96], sizes = [8, 32], strides = [1, 1]} : vector<8x128xf32> to vector<8x32xf32>
    %72 = arith.mulf %69, %57 : vector<8x32xf32>
    %73 = arith.mulf %68, %70 : vector<8x32xf32>
    %74 = arith.addf %72, %73 : vector<8x32xf32>
    %75 = math.tanh %74 : vector<8x32xf32>
    %76 = arith.mulf %71, %75 : vector<8x32xf32>
    %77 = vector.extract_strided_slice %6 {offsets = [32, 0], sizes = [8, 128], strides = [1, 1]} : vector<64x128xf32> to vector<8x128xf32>
    %cst_19 = arith.constant dense<0.000000e+00> : vector<8x128xf32>
    %78 = tpu.matmul %76, %1, %cst_19 {dimension_numbers = #tpu.dot_dimension_numbers<[1], [0], [0], [1], [0, 0, 1, 1], [], []>} : vector<8x32xf32>, vector<32x128xf32>, vector<8x128xf32> -> vector<8x128xf32>
    %79 = arith.addf %77, %78 : vector<8x128xf32>
    %80 = math.tanh %79 : vector<8x128xf32>
    %cst_20 = arith.constant 5.000000e-01 : f32
    %81 = vector.broadcast %cst_20 : f32 to vector<8x128xf32>
    %82 = arith.mulf %81, %80 : vector<8x128xf32>
    %cst_21 = arith.constant 5.000000e-01 : f32
    %83 = vector.broadcast %cst_21 : f32 to vector<8x128xf32>
    %84 = arith.addf %82, %83 : vector<8x128xf32>
    %85 = vector.extract_strided_slice %84 {offsets = [0, 0], sizes = [8, 32], strides = [1, 1]} : vector<8x128xf32> to vector<8x32xf32>
    %86 = vector.extract_strided_slice %84 {offsets = [0, 32], sizes = [8, 32], strides = [1, 1]} : vector<8x128xf32> to vector<8x32xf32>
    %87 = vector.extract_strided_slice %80 {offsets = [0, 64], sizes = [8, 32], strides = [1, 1]} : vector<8x128xf32> to vector<8x32xf32>
    %88 = vector.extract_strided_slice %84 {offsets = [0, 96], sizes = [8, 32], strides = [1, 1]} : vector<8x128xf32> to vector<8x32xf32>
    %89 = arith.mulf %86, %74 : vector<8x32xf32>
    %90 = arith.mulf %85, %87 : vector<8x32xf32>
    %91 = arith.addf %89, %90 : vector<8x32xf32>
    %92 = math.tanh %91 : vector<8x32xf32>
    %93 = arith.mulf %88, %92 : vector<8x32xf32>
    %94 = vector.extract_strided_slice %6 {offsets = [40, 0], sizes = [8, 128], strides = [1, 1]} : vector<64x128xf32> to vector<8x128xf32>
    %cst_22 = arith.constant dense<0.000000e+00> : vector<8x128xf32>
    %95 = tpu.matmul %93, %1, %cst_22 {dimension_numbers = #tpu.dot_dimension_numbers<[1], [0], [0], [1], [0, 0, 1, 1], [], []>} : vector<8x32xf32>, vector<32x128xf32>, vector<8x128xf32> -> vector<8x128xf32>
    %96 = arith.addf %94, %95 : vector<8x128xf32>
    %97 = math.tanh %96 : vector<8x128xf32>
    %cst_23 = arith.constant 5.000000e-01 : f32
    %98 = vector.broadcast %cst_23 : f32 to vector<8x128xf32>
    %99 = arith.mulf %98, %97 : vector<8x128xf32>
    %cst_24 = arith.constant 5.000000e-01 : f32
    %100 = vector.broadcast %cst_24 : f32 to vector<8x128xf32>
    %101 = arith.addf %99, %100 : vector<8x128xf32>
    %102 = vector.extract_strided_slice %101 {offsets = [0, 0], sizes = [8, 32], strides = [1, 1]} : vector<8x128xf32> to vector<8x32xf32>
    %103 = vector.extract_strided_slice %101 {offsets = [0, 32], sizes = [8, 32], strides = [1, 1]} : vector<8x128xf32> to vector<8x32xf32>
    %104 = vector.extract_strided_slice %97 {offsets = [0, 64], sizes = [8, 32], strides = [1, 1]} : vector<8x128xf32> to vector<8x32xf32>
    %105 = vector.extract_strided_slice %101 {offsets = [0, 96], sizes = [8, 32], strides = [1, 1]} : vector<8x128xf32> to vector<8x32xf32>
    %106 = arith.mulf %103, %91 : vector<8x32xf32>
    %107 = arith.mulf %102, %104 : vector<8x32xf32>
    %108 = arith.addf %106, %107 : vector<8x32xf32>
    %109 = math.tanh %108 : vector<8x32xf32>
    %110 = arith.mulf %105, %109 : vector<8x32xf32>
    %111 = vector.extract_strided_slice %6 {offsets = [48, 0], sizes = [8, 128], strides = [1, 1]} : vector<64x128xf32> to vector<8x128xf32>
    %cst_25 = arith.constant dense<0.000000e+00> : vector<8x128xf32>
    %112 = tpu.matmul %110, %1, %cst_25 {dimension_numbers = #tpu.dot_dimension_numbers<[1], [0], [0], [1], [0, 0, 1, 1], [], []>} : vector<8x32xf32>, vector<32x128xf32>, vector<8x128xf32> -> vector<8x128xf32>
    %113 = arith.addf %111, %112 : vector<8x128xf32>
    %114 = math.tanh %113 : vector<8x128xf32>
    %cst_26 = arith.constant 5.000000e-01 : f32
    %115 = vector.broadcast %cst_26 : f32 to vector<8x128xf32>
    %116 = arith.mulf %115, %114 : vector<8x128xf32>
    %cst_27 = arith.constant 5.000000e-01 : f32
    %117 = vector.broadcast %cst_27 : f32 to vector<8x128xf32>
    %118 = arith.addf %116, %117 : vector<8x128xf32>
    %119 = vector.extract_strided_slice %118 {offsets = [0, 0], sizes = [8, 32], strides = [1, 1]} : vector<8x128xf32> to vector<8x32xf32>
    %120 = vector.extract_strided_slice %118 {offsets = [0, 32], sizes = [8, 32], strides = [1, 1]} : vector<8x128xf32> to vector<8x32xf32>
    %121 = vector.extract_strided_slice %114 {offsets = [0, 64], sizes = [8, 32], strides = [1, 1]} : vector<8x128xf32> to vector<8x32xf32>
    %122 = vector.extract_strided_slice %118 {offsets = [0, 96], sizes = [8, 32], strides = [1, 1]} : vector<8x128xf32> to vector<8x32xf32>
    %123 = arith.mulf %120, %108 : vector<8x32xf32>
    %124 = arith.mulf %119, %121 : vector<8x32xf32>
    %125 = arith.addf %123, %124 : vector<8x32xf32>
    %126 = math.tanh %125 : vector<8x32xf32>
    %127 = arith.mulf %122, %126 : vector<8x32xf32>
    %128 = vector.extract_strided_slice %6 {offsets = [56, 0], sizes = [8, 128], strides = [1, 1]} : vector<64x128xf32> to vector<8x128xf32>
    %cst_28 = arith.constant dense<0.000000e+00> : vector<8x128xf32>
    %129 = tpu.matmul %127, %1, %cst_28 {dimension_numbers = #tpu.dot_dimension_numbers<[1], [0], [0], [1], [0, 0, 1, 1], [], []>} : vector<8x32xf32>, vector<32x128xf32>, vector<8x128xf32> -> vector<8x128xf32>
    %130 = arith.addf %128, %129 : vector<8x128xf32>
    %131 = math.tanh %130 : vector<8x128xf32>
    %cst_29 = arith.constant 5.000000e-01 : f32
    %132 = vector.broadcast %cst_29 : f32 to vector<8x128xf32>
    %133 = arith.mulf %132, %131 : vector<8x128xf32>
    %cst_30 = arith.constant 5.000000e-01 : f32
    %134 = vector.broadcast %cst_30 : f32 to vector<8x128xf32>
    %135 = arith.addf %133, %134 : vector<8x128xf32>
    %136 = vector.extract_strided_slice %135 {offsets = [0, 0], sizes = [8, 32], strides = [1, 1]} : vector<8x128xf32> to vector<8x32xf32>
    %137 = vector.extract_strided_slice %135 {offsets = [0, 32], sizes = [8, 32], strides = [1, 1]} : vector<8x128xf32> to vector<8x32xf32>
    %138 = vector.extract_strided_slice %131 {offsets = [0, 64], sizes = [8, 32], strides = [1, 1]} : vector<8x128xf32> to vector<8x32xf32>
    %139 = vector.extract_strided_slice %135 {offsets = [0, 96], sizes = [8, 32], strides = [1, 1]} : vector<8x128xf32> to vector<8x32xf32>
    %140 = arith.mulf %137, %125 : vector<8x32xf32>
    %141 = arith.mulf %136, %138 : vector<8x32xf32>
    %142 = arith.addf %140, %141 : vector<8x32xf32>
    %143 = math.tanh %142 : vector<8x32xf32>
    %144 = arith.mulf %139, %143 : vector<8x32xf32>
    %c48 = arith.constant 48 : index
    %c0_31 = arith.constant 0 : index
    %145 = vector.load %arg1[%c48, %c0_31] : memref<88x128xf32, #tpu.memory_space<vmem>>, vector<32x128xf32>
    %c80 = arith.constant 80 : index
    %c0_32 = arith.constant 0 : index
    %146 = vector.load %arg1[%c80, %c0_32] : memref<88x128xf32, #tpu.memory_space<vmem>>, vector<1x128xf32>
    %cst_33 = arith.constant dense<0.000000e+00> : vector<8x128xf32>
    %147 = tpu.matmul %144, %145, %cst_33 {dimension_numbers = #tpu.dot_dimension_numbers<[1], [0], [0], [1], [0, 0, 1, 1], [], []>} : vector<8x32xf32>, vector<32x128xf32>, vector<8x128xf32> -> vector<8x128xf32>
    %148 = vector.broadcast %146 : vector<1x128xf32> to vector<8x128xf32>
    %149 = arith.addf %147, %148 : vector<8x128xf32>
    %c0_34 = arith.constant 0 : index
    %c0_35 = arith.constant 0 : index
    %150 = vector.load %arg2[%c0_34, %c0_35] : memref<8x128xf32, #tpu.memory_space<vmem>>, vector<8x128xf32>
    tpu.vector_store %arg2[%c0_34, %c0_35], %149 {strides = array<i32>} : memref<8x128xf32, #tpu.memory_space<vmem>>, vector<8x128xf32>,
    return
  }
}

</mosaic_0001>

<bundles_post_ra>
// kernel: _lambda_.1
= control target key start
LH: loop header
LB: loop body
LE: loop exit
PB: predicated region body
PF: predicated region fallthrough
CT: control target
= control target key end

     0   :  { %vm51_vm0 = vcmask 1043456   ;;  %vm26_vm1 = vcmask 31744   ;;  %v555_v7 = vmov 0.0   ;;  %s556_s25 = smov 64   ;;  %s557_s26 = smov 32   ;;  %vm96_vm2 = vcmask 261120   ;;  %s740_s1 = inlined_call_operand.vmem [shape: f32[88,128], index: 1, kind: input, shape index: {}]   ;;  %s741_s0 = inlined_call_operand.vmem [shape: f32[64,4], index: 0, kind: input, shape index: {}]   ;;  %s742_s2 = inlined_call_operand.vmem [shape: f32[8,128], index: 2, kind: output, shape index: {}]  }
   0x1   :  { %v11_v0 = vld [vmem:[%s740_s1] sm:$0xf]  ;;  %v22_v1 = vld [vmem:[%s741_s0 + $0x28] sm:$0xff]  ;;  %v591_v4 = vld [vmem:[%s740_s1 + $0x18] sm:$0xff] }
   0x2   :  { %v582_v2 = vld [vmem:[%s740_s1 + $0x20] sm:$0xff]  ;;  %516 = vmatpush.msk.msra.mxu1 %vm51_vm0, %v11_v0  ;;  %499 = vmatpush.msk.msra.mxu0 %vm51_vm0, %v11_v0  ;;  %v598_v5 = vld [vmem:[%s740_s1 + $0x10] sm:$0xff]  ;;  %v606_v6 = vld [vmem:[%s740_s1 + $0x8] sm:$0xff] }
   0x3   :  { %v17_v3 = vld [vmem:[%s741_s0] sm:$0xff]  ;;  %505 = vmatmul.msk.f32.vlgmr.msra.gmra.mxu1 %vm26_vm1, %v22_v1  ;;  %517 = vmatpush.msk.msra.mxu2 %vm51_vm0, %v11_v0  ;;  %v633_v10 = vld [vmem:[%s740_s1 + $0x28] ss:$0 sm:$0xff]  ;;  %v23_v23 = vld [vmem:[%s741_s0 + $0x30] sm:$0xff] }
   0x4   :  { %500 = vmatmul.msk.f32.vlgmr.msra.gmra.mxu0 %vm26_vm1, %v17_v3  ;;  %112 = vmatpush.msrb.mxu1 %v582_v2  ;;  %v24_v24 = vld [vmem:[%s741_s0 + $0x38] sm:$0xff]  ;;  %v18_v27 = vld [vmem:[%s741_s0 + $0x8] sm:$0xff]  ;;  %v19_v46 = vld [vmem:[%s741_s0 + $0x10] sm:$0xff] }
   0x5   :  { %158 = vmatpush.msrb.mxu2 %v582_v2  ;;  %204 = vmatpush.msra.mxu3 %v582_v2  ;;  %v20_v61 = vld [vmem:[%s741_s0 + $0x18] sm:$0xff] }
   0x6   :  { %113 = vmatpush.msrb.mxu1 %v591_v4  ;;  %506 = vmatmul.msk.f32.vlgmr.msra.gmra.mxu2 %vm26_vm1, %v23_v23 }
   0x7   :  { %159 = vmatpush.msrb.mxu2 %v591_v4  ;;  %205 = vmatpush.msra.mxu3 %v591_v4 }
   0x8   :  { %114 = vmatpush.msrb.mxu1 %v598_v5 }
   0x9   :  { %160 = vmatpush.msrb.mxu2 %v598_v5  ;;  %206 = vmatpush.msra.mxu3 %v598_v5 }
   0xa   :  { %115 = vmatpush.msrb.mxu1 %v606_v6 }
   0xb   :  { %116 = vmatmul.f32.vlgmr.msrb.gmra.mxu1 %v555_v7  ;;  %161 = vmatpush.msrb.mxu2 %v606_v6 }
   0xc   :  { %207 = vmatpush.msra.mxu3 %v606_v6  ;;  %250 = vmatpush.msra.mxu1 %v582_v2 }
   0xd   :  { %296 = vmatpush.msra.mxu2 %v582_v2  ;;  %501 = vmatmul.msk.f32.gmra.mxu0 %vm26_vm1, %v18_v27 }
   0xe   :  { %342 = vmatpush.msrb.mxu3 %v582_v2  ;;  %251 = vmatpush.msra.mxu1 %v591_v4 }
   0xf   :  { %297 = vmatpush.msra.mxu2 %v591_v4 }
  0x10   :  { %343 = vmatpush.msrb.mxu3 %v591_v4  ;;  %252 = vmatpush.msra.mxu1 %v598_v5 }
  0x11   :  { %298 = vmatpush.msra.mxu2 %v598_v5 }
  0x12   :  { %344 = vmatpush.msrb.mxu3 %v598_v5  ;;  %253 = vmatpush.msra.mxu1 %v606_v6 }
  0x13   :  { %299 = vmatpush.msra.mxu2 %v606_v6 }
  0x14   :  { %345 = vmatpush.msrb.mxu3 %v606_v6  ;;  %388 = vmatpush.msrb.mxu1 %v582_v2 }
  0x15   :  { %507 = vmatmul.msk.f32.gmra.mxu2 %vm26_vm1, %v24_v24  ;;  %502 = vmatmul.msk.f32.gmra.mxu0 %vm26_vm1, %v19_v46 }
  0x16   :  { %389 = vmatpush.msrb.mxu1 %v591_v4 }
  0x18   :  { %390 = vmatpush.msrb.mxu1 %v598_v5 }
  0x1a   :  { %391 = vmatpush.msrb.mxu1 %v606_v6 }
  0x1d   :  { %503 = vmatmul.msk.f32.gmra.mxu0 %vm26_vm1, %v20_v61 }
  0x80   :  { %v628_v8 = vpop.f32.mrf.mxu1 }
  0x81   :  { %v72_v9 = vpop.f32.mrf.mxu0 }
  0x82   :  { %v73_v11 = vadd.f32 %v633_v10, %v72_v9 }
  0x88   :  { %v117_v12 = vpop.f32.mrf.mxu1 }
  0x89   :  { %v120_v13 = vadd.f32 %v117_v12, %v73_v11  ;;  %v661_v29 = vpop.f32.mrf.mxu2 }
  0x8a   :  { %v75_v31 = vpop.f32.mrf.mxu0 }
  0x8b   :  { %523 = vtanh.f32 %v120_v13  ;;  %v76_v32 = vadd.f32 %v633_v10, %v75_v31 }
  0x91   :  { %v524_v14 = vpop.eup %523 }
  0x92   :  { %126 = vrot.lane.b32.xlu0 %v524_v14, %s556_s25  ;;  %v122_v15 = vmul.f32 0.5, %v524_v14  ;;  %v78_v48 = vpop.f32.mrf.mxu0 }
  0x93   :  { %v79_v49 = vadd.f32 %v633_v10, %v78_v48 }
  0x94   :  { %v123_v16 = vadd.f32 0.5, %v122_v15 }
  0x96   :  { %v124_v19 = vmul.f32 0.0, %v123_v16 }
  0x98   :  { %v663_v30 = vpop.f32.mrf.mxu2 }
  0x9a   :  { %v81_v1 = vpop.f32.mrf.mxu0 }
 0x104   :  { %v127_v17 = vpop.permute.xlu0 %126 }
 0x105   :  { %v129_v18 = vmul.f32 %v127_v17, %v123_v16 }
 0x107   :  { %131 = vrot.lane.b32.xlu0 %v129_v18, %s557_s26  ;;  %v21_v18 = vld [vmem:[%s741_s0 + $0x20] sm:$0xff] }
 0x108   :  { %504 = vmatmul.msk.f32.gmra.mxu0 %vm26_vm1, %v21_v18 }
 0x179   :  { %v132_v20 = vpop.permute.xlu0 %131 }
 0x17a   :  { %v134_v21 = vadd.f32 %v132_v20, %v124_v19 }
 0x17c   :  { %525 = vtanh.f32 %v134_v21 }
 0x182   :  { %v526_v22 = vpop.eup %525 }
 0x183   :  { %137 = vrot.lane.b32.xlu1 %v526_v22, %s556_s25 }
 0x185   :  { %v84_v20 = vpop.f32.mrf.mxu0 }
 0x1f5   :  { %v138_v25 = vpop.permute.xlu1 %137 }
 0x1f6   :  { %v140_v26 = vmul.f32 %v138_v25, %v123_v16 }
 0x1f8   :  { %142 = vrot.lane.b32.xlu1 %v140_v26, %s557_s26 }
 0x26a   :  { %v143_v28 = vpop.permute.xlu1 %142 }
 0x26b   :  { %508 = vmatmul.msk.f32.vlgmr.msrb.gmra.mxu2 %vm96_vm2, %v143_v28 }
 0x26c   :  { %434 = vmatpush.msrb.mxu2 %v582_v2  ;;  %v82_v2 = vadd.f32 %v633_v10, %v81_v1 }
 0x26e   :  { %435 = vmatpush.msrb.mxu2 %v591_v4 }
 0x270   :  { %436 = vmatpush.msrb.mxu2 %v598_v5 }
 0x272   :  { %437 = vmatpush.msrb.mxu2 %v606_v6 }
 0x2ee   :  { %v163_v33 = vpop.f32.mrf.mxu2 }
 0x2ef   :  { %v166_v34 = vadd.f32 %v163_v33, %v76_v32 }
 0x2f1   :  { %527 = vtanh.f32 %v166_v34 }
 0x2f7   :  { %v528_v35 = vpop.eup %527 }
 0x2f8   :  { %172 = vrot.lane.b32.xlu2 %v528_v35, %s556_s25  ;;  %v168_v36 = vmul.f32 0.5, %v528_v35 }
 0x2fa   :  { %v169_v37 = vadd.f32 0.5, %v168_v36 }
 0x2fc   :  { %v170_v40 = vmul.f32 %v169_v37, %v134_v21  ;;  %v85_v21 = vadd.f32 %v633_v10, %v84_v20 }
 0x352   :  { %v173_v38 = vpop.permute.xlu2 %172 }
 0x353   :  { %v175_v39 = vmul.f32 %v173_v38, %v169_v37  ;;  %v88_v38 = vadd.f32 %v633_v10, %v628_v8 }
 0x355   :  { %177 = vrot.lane.b32.xlu2 %v175_v39, %s557_s26 }
 0x3af   :  { %v178_v41 = vpop.permute.xlu2 %177 }
 0x3b0   :  { %v180_v42 = vadd.f32 %v178_v41, %v170_v40 }
 0x3b2   :  { %529 = vtanh.f32 %v180_v42 }
 0x3b8   :  { %v530_v43 = vpop.eup %529 }
 0x3b9   :  { %183 = vrot.lane.b32.xlu0 %v530_v43, %s556_s25 }
 0x42b   :  { %v184_v44 = vpop.permute.xlu0 %183 }
 0x42c   :  { %v186_v45 = vmul.f32 %v184_v44, %v169_v37 }
 0x42e   :  { %188 = vrot.lane.b32.xlu1 %v186_v45, %s557_s26 }
 0x4a0   :  { %v189_v47 = vpop.permute.xlu1 %188 }
 0x4a1   :  { %509 = vmatmul.msk.f32.vlgmr.msra.gmra.mxu3 %vm96_vm2, %v189_v47 }
 0x524   :  { %v209_v50 = vpop.f32.mrf.mxu3 }
 0x525   :  { %v212_v51 = vadd.f32 %v209_v50, %v79_v49 }
 0x527   :  { %531 = vtanh.f32 %v212_v51 }
 0x52d   :  { %v532_v52 = vpop.eup %531 }
 0x52e   :  { %218 = vrot.lane.b32.xlu2 %v532_v52, %s556_s25  ;;  %v214_v53 = vmul.f32 0.5, %v532_v52  ;;  %v91_v52 = vadd.f32 %v633_v10, %v661_v29 }
 0x530   :  { %v215_v54 = vadd.f32 0.5, %v214_v53 }
 0x532   :  { %v216_v57 = vmul.f32 %v215_v54, %v180_v42 }
 0x588   :  { %v219_v55 = vpop.permute.xlu2 %218 }
 0x589   :  { %v221_v56 = vmul.f32 %v219_v55, %v215_v54 }
 0x58b   :  { %223 = vrot.lane.b32.xlu0 %v221_v56, %s557_s26 }
 0x5fd   :  { %v224_v58 = vpop.permute.xlu0 %223 }
 0x5fe   :  { %v226_v59 = vadd.f32 %v224_v58, %v216_v57 }
 0x600   :  { %533 = vtanh.f32 %v226_v59 }
 0x606   :  { %v534_v60 = vpop.eup %533 }
 0x607   :  { %229 = vrot.lane.b32.xlu1 %v534_v60, %s556_s25 }
 0x679   :  { %v230_v62 = vpop.permute.xlu1 %229 }
 0x67a   :  { %v232_v63 = vmul.f32 %v230_v62, %v215_v54 }
 0x67c   :  { %234 = vrot.lane.b32.xlu2 %v232_v63, %s557_s26 }
 0x6d6   :  { %v235_v0 = vpop.permute.xlu2 %234 }
 0x6d7   :  { %510 = vmatmul.msk.f32.vlgmr.msra.gmra.mxu1 %vm96_vm2, %v235_v0 }
 0x754   :  { %v255_v3 = vpop.f32.mrf.mxu1 }
 0x755   :  { %v258_v4 = vadd.f32 %v255_v3, %v82_v2  ;;  %v94_v2 = vadd.f32 %v633_v10, %v663_v30  ;;  %v466_v10 = vld [vmem:[%s740_s1 + $0x48] sm:$0xff]  ;;  %v465_v30 = vld [vmem:[%s740_s1 + $0x40] sm:$0xff] }
 0x756   :  { %486 = vmatpush.msra.mxu3 %v466_v10 }
 0x757   :  { %535 = vtanh.f32 %v258_v4 }
 0x758   :  { %487 = vmatpush.msra.mxu3 %v465_v30 }
 0x75d   :  { %v536_v5 = vpop.eup %535 }
 0x75e   :  { %264 = vrot.lane.b32.xlu0 %v536_v5, %s556_s25  ;;  %v260_v6 = vmul.f32 0.5, %v536_v5 }
 0x760   :  { %v261_v7 = vadd.f32 0.5, %v260_v6 }
 0x762   :  { %v262_v12 = vmul.f32 %v261_v7, %v226_v59 }
 0x7d0   :  { %v265_v9 = vpop.permute.xlu0 %264 }
 0x7d1   :  { %v267_v11 = vmul.f32 %v265_v9, %v261_v7 }
 0x7d3   :  { %269 = vrot.lane.b32.xlu1 %v267_v11, %s557_s26 }
 0x845   :  { %v270_v13 = vpop.permute.xlu1 %269 }
 0x846   :  { %v272_v14 = vadd.f32 %v270_v13, %v262_v12 }
 0x848   :  { %537 = vtanh.f32 %v272_v14 }
 0x84e   :  { %v538_v15 = vpop.eup %537 }
 0x84f   :  { %275 = vrot.lane.b32.xlu2 %v538_v15, %s556_s25 }
 0x8a9   :  { %v276_v16 = vpop.permute.xlu2 %275 }
 0x8aa   :  { %v278_v17 = vmul.f32 %v276_v16, %v261_v7  ;;  %v464_v16 = vld [vmem:[%s740_s1 + $0x38] sm:$0xff] }
 0x8ab   :  { %488 = vmatpush.msra.mxu3 %v464_v16 }
 0x8ac   :  { %280 = vrot.lane.b32.xlu0 %v278_v17, %s557_s26  ;;  %v463_v17 = vld [vmem:[%s740_s1 + $0x30] sm:$0xff] }
 0x8ad   :  { %489 = vmatpush.msra.mxu3 %v463_v17 }
 0x91e   :  { %v281_v19 = vpop.permute.xlu0 %280 }
 0x91f   :  { %511 = vmatmul.msk.f32.vlgmr.msra.gmra.mxu2 %vm96_vm2, %v281_v19 }
 0x9a2   :  { %v301_v22 = vpop.f32.mrf.mxu2 }
 0x9a3   :  { %v304_v23 = vadd.f32 %v301_v22, %v85_v21  ;;  %v522_v21 = vld [vmem:[%s740_s1 + $0x50] ss:$0 sm:$0xff] }
 0x9a5   :  { %539 = vtanh.f32 %v304_v23 }
 0x9ab   :  { %v540_v24 = vpop.eup %539 }
 0x9ac   :  { %310 = vrot.lane.b32.xlu1 %v540_v24, %s556_s25  ;;  %v306_v25 = vmul.f32 0.5, %v540_v24 }
 0x9ae   :  { %v307_v26 = vadd.f32 0.5, %v306_v25 }
 0x9b0   :  { %v308_v31 = vmul.f32 %v307_v26, %v272_v14 }
 0xa1e   :  { %v311_v27 = vpop.permute.xlu1 %310 }
 0xa1f   :  { %v313_v28 = vmul.f32 %v311_v27, %v307_v26 }
 0xa21   :  { %315 = vrot.lane.b32.xlu2 %v313_v28, %s557_s26 }
 0xa7b   :  { %v316_v32 = vpop.permute.xlu2 %315 }
 0xa7c   :  { %v318_v33 = vadd.f32 %v316_v32, %v308_v31 }
 0xa7e   :  { %541 = vtanh.f32 %v318_v33 }
 0xa84   :  { %v542_v34 = vpop.eup %541 }
 0xa85   :  { %321 = vrot.lane.b32.xlu0 %v542_v34, %s556_s25 }
 0xaf7   :  { %v322_v35 = vpop.permute.xlu0 %321 }
 0xaf8   :  { %v324_v36 = vmul.f32 %v322_v35, %v307_v26 }
 0xafa   :  { %326 = vrot.lane.b32.xlu1 %v324_v36, %s557_s26 }
 0xb6c   :  { %v327_v37 = vpop.permute.xlu1 %326 }
 0xb6d   :  { %512 = vmatmul.msk.f32.vlgmr.msrb.gmra.mxu3 %vm96_vm2, %v327_v37 }
 0xbf0   :  { %v347_v39 = vpop.f32.mrf.mxu3 }
 0xbf1   :  { %v350_v40 = vadd.f32 %v347_v39, %v88_v38 }
 0xbf3   :  { %543 = vtanh.f32 %v350_v40 }
 0xbf9   :  { %v544_v41 = vpop.eup %543 }
 0xbfa   :  { %356 = vrot.lane.b32.xlu2 %v544_v41, %s556_s25  ;;  %v352_v42 = vmul.f32 0.5, %v544_v41 }
 0xbfc   :  { %v353_v43 = vadd.f32 0.5, %v352_v42 }
 0xbfe   :  { %v354_v46 = vmul.f32 %v353_v43, %v318_v33 }
 0xc54   :  { %v357_v44 = vpop.permute.xlu2 %356 }
 0xc55   :  { %v359_v45 = vmul.f32 %v357_v44, %v353_v43 }
 0xc57   :  { %361 = vrot.lane.b32.xlu0 %v359_v45, %s557_s26 }
 0xcc9   :  { %v362_v47 = vpop.permute.xlu0 %361 }
 0xcca   :  { %v364_v48 = vadd.f32 %v362_v47, %v354_v46 }
 0xccc   :  { %545 = vtanh.f32 %v364_v48 }
 0xcd2   :  { %v546_v49 = vpop.eup %545 }
 0xcd3   :  { %367 = vrot.lane.b32.xlu1 %v546_v49, %s556_s25 }
 0xd45   :  { %v368_v8 = vpop.permute.xlu1 %367 }
 0xd46   :  { %v370_v50 = vmul.f32 %v368_v8, %v353_v43 }
 0xd48   :  { %372 = vrot.lane.b32.xlu2 %v370_v50, %s557_s26 }
 0xda2   :  { %v373_v51 = vpop.permute.xlu2 %372 }
 0xda3   :  { %513 = vmatmul.msk.f32.vlgmr.msrb.gmra.mxu1 %vm96_vm2, %v373_v51 }
 0xe20   :  { %v393_v53 = vpop.f32.mrf.mxu1 }
 0xe21   :  { %v396_v54 = vadd.f32 %v393_v53, %v91_v52 }
 0xe23   :  { %547 = vtanh.f32 %v396_v54 }
 0xe29   :  { %v548_v55 = vpop.eup %547 }
 0xe2a   :  { %402 = vrot.lane.b32.xlu0 %v548_v55, %s556_s25  ;;  %v398_v56 = vmul.f32 0.5, %v548_v55 }
 0xe2c   :  { %v399_v57 = vadd.f32 0.5, %v398_v56 }
 0xe2e   :  { %v400_v60 = vmul.f32 %v399_v57, %v364_v48 }
 0xe9c   :  { %v403_v58 = vpop.permute.xlu0 %402 }
 0xe9d   :  { %v405_v59 = vmul.f32 %v403_v58, %v399_v57 }
 0xe9f   :  { %407 = vrot.lane.b32.xlu1 %v405_v59, %s557_s26 }
 0xf11   :  { %v408_v61 = vpop.permute.xlu1 %407 }
 0xf12   :  { %v410_v62 = vadd.f32 %v408_v61, %v400_v60 }
 0xf14   :  { %549 = vtanh.f32 %v410_v62 }
 0xf1a   :  { %v550_v63 = vpop.eup %549 }
 0xf1b   :  { %413 = vrot.lane.b32.xlu2 %v550_v63, %s556_s25 }
 0xf75   :  { %v414_v29 = vpop.permute.xlu2 %413 }
 0xf76   :  { %v416_v0 = vmul.f32 %v414_v29, %v399_v57 }
 0xf78   :  { %418 = vrot.lane.b32.xlu0 %v416_v0, %s557_s26 }
 0xfea   :  { %v419_v1 = vpop.permute.xlu0 %418 }
 0xfeb   :  { %514 = vmatmul.msk.f32.vlgmr.msrb.gmra.mxu2 %vm96_vm2, %v419_v1 }
0x106e   :  { %v439_v3 = vpop.f32.mrf.mxu2 }
0x106f   :  { %v442_v4 = vadd.f32 %v439_v3, %v94_v2 }
0x1071   :  { %551 = vtanh.f32 %v442_v4 }
0x1077   :  { %v552_v5 = vpop.eup %551 }
0x1078   :  { %448 = vrot.lane.b32.xlu1 %v552_v5, %s556_s25  ;;  %v444_v6 = vmul.f32 0.5, %v552_v5 }
0x107a   :  { %v445_v7 = vadd.f32 0.5, %v444_v6 }
0x107c   :  { %v446_v12 = vmul.f32 %v445_v7, %v410_v62 }
0x10ea   :  { %v449_v9 = vpop.permute.xlu1 %448 }
0x10eb   :  { %v451_v11 = vmul.f32 %v449_v9, %v445_v7 }
0x10ed   :  { %453 = vrot.lane.b32.xlu2 %v451_v11, %s557_s26 }
0x1147   :  { %v454_v13 = vpop.permute.xlu2 %453 }
0x1148   :  { %v456_v14 = vadd.f32 %v454_v13, %v446_v12 }
0x114a   :  { %553 = vtanh.f32 %v456_v14 }
0x1150   :  { %v554_v15 = vpop.eup %553 }
0x1151   :  { %459 = vrot.lane.b32.xlu0 %v554_v15, %s556_s25 }
0x11c3   :  { %v460_v18 = vpop.permute.xlu0 %459 }
0x11c4   :  { %v462_v19 = vmul.f32 %v460_v18, %v445_v7 }
0x11c6   :  { %470 = vrot.lane.b32.xlu1 %v462_v19, %s557_s26 }
0x1238   :  { %v471_v20 = vpop.permute.xlu1 %470 }
0x1239   :  { %515 = vmatmul.msk.f32.vlgmr.msra.gmra.mxu3 %vm96_vm2, %v471_v20 }
0x12bc   :  { %v491_v22 = vpop.f32.mrf.mxu3 }
0x12bd   :  { %v492_v23 = vadd.f32 %v522_v21, %v491_v22 }
0x12bf   :  { %494 = vst [vmem:[%s742_s2] sm:$0xff] %v492_v23 }

</bundles_post_ra>
